<compile_context>
chip_gen: v7x
topology: tpu7x:2x2x1
jax: 0.10.0
libtpu: 0.0.40
codegen_flags: <defaults>
</compile_context>

<pallas_src>
import functools

import jax
import jax.numpy as jnp
from jax.experimental import pallas as pl
from jax.experimental.pallas import tpu as pltpu


# ----------------------------------------------------------------------------
# Fused kernel: whole MLP forward in one pallas_call, activations in VMEM.
# ----------------------------------------------------------------------------
def _mlp_fused_kernel(*refs, n_pairs, jump, dropout_p, last_act, eps, inv_batch):
    # refs layout:
    #   [0] seed        (1,) int32, SMEM
    #   [1] row_mask    (B_pad, 1) f32   (1 for real rows, 0 for batch padding)
    #   [2] x           (B_pad, in_pad) f32
    #   then per layer pair: W (fin,hid) bf16, b (1,hid), gamma (1,hid), beta (1,hid)
    #   then last layer: [W_hid, W_in, b] if jump else [W, b]   (W* in bf16)
    #   [-1] out        (B_pad, out_pad) f32
    seed_ref, mask_ref, x_ref = refs[0], refs[1], refs[2]
    out_ref = refs[-1]

    seed_u32 = seed_ref[0].astype(jnp.uint32)
    keep_thresh = jnp.uint32(
        min(int((1.0 - dropout_p) * 4294967296.0), 4294967295))
    keep_scale = jnp.float32(1.0 / (1.0 - dropout_p)) if dropout_p < 1.0 else jnp.float32(0.0)
    site_counter = [0]

    def _dropout(y):
        # F.dropout (training=True): keep with prob (1-p), rescale by 1/(1-p).
        if dropout_p <= 0.0:
            return y
        if dropout_p >= 1.0:
            return jnp.zeros_like(y)
        site = site_counter[0]
        site_counter[0] += 1
        # Counter-based hash PRNG (murmur3-style finalizer) — pure jnp int ops,
        # lowers on TPU VPU and in interpret mode; distinct per dropout site.
        r = jax.lax.broadcasted_iota(jnp.uint32, y.shape, 0)
        c = jax.lax.broadcasted_iota(jnp.uint32, y.shape, 1)
        h = (r * jnp.uint32(0x9E3779B1)) ^ (c * jnp.uint32(0x85EBCA77))
        h = h ^ (seed_u32 + jnp.uint32((site * 0x27D4EB2F) & 0xFFFFFFFF))
        h = h ^ (h >> 16)
        h = h * jnp.uint32(0x85EBCA6B)
        h = h ^ (h >> 13)
        h = h * jnp.uint32(0xC2B2AE35)
        h = h ^ (h >> 16)
        keep = jnp.where(h < keep_thresh, keep_scale,
                         jnp.float32(0.0)).astype(jnp.float32)
        return y * keep

    row_mask = mask_ref[...]                       # (B_pad, 1)
    x_in = x_ref[...].astype(jnp.float32)          # original (padded) input
    x = x_in

    def _bdot(a_f32, w_ref):
        # bf16 operands, f32 accumulation on the MXU.
        return jnp.dot(a_f32.astype(jnp.bfloat16), w_ref[...],
                       preferred_element_type=jnp.float32)

    idx = 3
    for _ in range(n_pairs):
        w_ref = refs[idx]
        b = refs[idx + 1][...]
        g = refs[idx + 2][...]
        be = refs[idx + 3][...]
        idx += 4

        # Linear -> relu -> dropout
        y = _bdot(x, w_ref) + b
        y = _dropout(jnp.maximum(y, 0.0))

        # BatchNorm1d (batch stats, biased variance) -> relu -> dropout.
        # One-pass masked statistics: padded batch rows never pollute them.
        ym = y * row_mask
        s1 = jnp.sum(ym, axis=0, keepdims=True)
        s2 = jnp.sum(ym * y, axis=0, keepdims=True)
        mean = s1 * inv_batch
        var = jnp.maximum(s2 * inv_batch - mean * mean, 0.0)
        y = (y - mean) * jax.lax.rsqrt(var + eps) * g + be
        y = _dropout(jnp.maximum(y, 0.0))
        x = y

    if jump:
        # concat([inp, x]) @ W  ==  inp @ W[:n_in] + x @ W[n_in:]
        w_hid_ref = refs[idx]
        w_in_ref = refs[idx + 1]
        b_last = refs[idx + 2][...]
        y = _bdot(x, w_hid_ref) + _bdot(x_in, w_in_ref) + b_last
    else:
        w_last_ref = refs[idx]
        b_last = refs[idx + 1][...]
        y = _bdot(x, w_last_ref) + b_last

    if last_act:
        y = jnp.tanh(y)
    out_ref[...] = y.astype(out_ref.dtype)


# ----------------------------------------------------------------------------
# Padding helpers (lane-dense features, sublane-aligned batch)
# ----------------------------------------------------------------------------
def _round_up(n, m):
    return ((n + m - 1) // m) * m


def _pad2(a, rows, cols):
    a = jnp.asarray(a, jnp.float32)
    pr, pc = rows - a.shape[0], cols - a.shape[1]
    if pr or pc:
        a = jnp.pad(a, ((0, pr), (0, pc)))
    return a


def _nbytes(a):
    return a.size * a.dtype.itemsize


# ----------------------------------------------------------------------------
# One-time parameter preparation: pad to lane multiples, cast weights to bf16.
# Call once; reuse the result across forwards (no per-call padding pass).
# ----------------------------------------------------------------------------
def prepare_mlp_params(params, *, jump=False):
    w0 = params["linears"][0][0]
    n_in, n_hidden = int(w0.shape[0]), int(w0.shape[1])
    w_last, b_last = params["last"]
    n_out = int(w_last.shape[1])

    in_pad = _round_up(n_in, 128)
    hid_pad = _round_up(n_hidden, 128)
    out_pad = _round_up(n_out, 128)

    weight_args = []
    for li, ((w, b), (g, be)) in enumerate(zip(params["linears"], params["bns"])):
        fin = in_pad if li == 0 else hid_pad
        weight_args += [
            _pad2(w, fin, hid_pad).astype(jnp.bfloat16),
            _pad2(b.reshape(1, -1), 1, hid_pad),
            _pad2(g.reshape(1, -1), 1, hid_pad),   # zero-padded gamma keeps padded cols at 0
            _pad2(be.reshape(1, -1), 1, hid_pad),
        ]
    if jump:
        # concat order in the reference is [inp, x]:
        #   rows [0, n_in)  of W_last act on the original input,
        #   rows [n_in, ..) act on the hidden activation.
        weight_args += [
            _pad2(w_last[n_in:], hid_pad, out_pad).astype(jnp.bfloat16),
            _pad2(w_last[:n_in], in_pad, out_pad).astype(jnp.bfloat16),
            _pad2(b_last.reshape(1, -1), 1, out_pad),
        ]
    else:
        weight_args += [
            _pad2(w_last, hid_pad, out_pad).astype(jnp.bfloat16),
            _pad2(b_last.reshape(1, -1), 1, out_pad),
        ]

    return dict(
        weight_args=weight_args,
        n_pairs=len(params["linears"]),
        jump=bool(jump),
        n_in=n_in, n_out=n_out,
        in_pad=in_pad, hid_pad=hid_pad, out_pad=out_pad,
    )


# ----------------------------------------------------------------------------
# Wrapper: one fused pallas_call for the whole forward pass
# ----------------------------------------------------------------------------
def mlp_forward(prepared, x, *, dropout=0.0, last_act=True, seed=0):
    x = jnp.asarray(x, jnp.float32)
    B, n_in = x.shape
    assert n_in == prepared["n_in"]

    B_pad = _round_up(B, 8)          # sublane alignment; batch grid TODO above
    in_pad = prepared["in_pad"]
    hid_pad = prepared["hid_pad"]
    out_pad = prepared["out_pad"]
    n_out = prepared["n_out"]

    seed_arr = jnp.asarray([seed], jnp.int32)
    row_mask = (jnp.arange(B_pad) < B).astype(jnp.float32).reshape(B_pad, 1)
    x_pad = _pad2(x, B_pad, in_pad)

    args = [seed_arr, row_mask, x_pad] + list(prepared["weight_args"])

    kern = functools.partial(
        _mlp_fused_kernel,
        n_pairs=prepared["n_pairs"],
        jump=prepared["jump"],
        dropout_p=float(dropout),
        last_act=bool(last_act),
        eps=1e-5,
        inv_batch=1.0 / float(B),
    )

    # Size the scoped-VMEM limit from the actual resident footprint
    # (whole model + activations stay in VMEM), with headroom.
    out_bytes = B_pad * out_pad * 4
    act_bytes = 4 * B_pad * max(hid_pad, in_pad, out_pad) * 4
    resident = sum(_nbytes(a) for a in args) + out_bytes + act_bytes
    vmem_limit = int(min(2 * resident + (4 << 20), 100 << 20))

    smem_spec = pl.BlockSpec(memory_space=pltpu.MemorySpace.SMEM)
    vmem_spec = pl.BlockSpec(memory_space=pltpu.MemorySpace.VMEM)

    out = pl.pallas_call(
        kern,
        out_shape=jax.ShapeDtypeStruct((B_pad, out_pad), jnp.float32),
        in_specs=[smem_spec] + [vmem_spec] * (len(args) - 1),
        out_specs=vmem_spec,
        compiler_params=pltpu.CompilerParams(vmem_limit_bytes=vmem_limit),
    )(*args)
    return out[:B, :n_out]


# ----------------------------------------------------------------------------
# Parameter init (deterministic, mimics PyTorch default Linear init bounds).
# Weights are stored as (in, out) == PyTorch weight.T ; biases as (n,).
# ----------------------------------------------------------------------------
def init_mlp_params(key, n_input, n_output, n_hidden, n_hidden_layers, jump):
    params = {"linears": [], "bns": []}

    def _linear(key, fan_in, fan_out):
        k_w, k_b = jax.random.split(key)
        bound = 1.0 / float(fan_in) ** 0.5
        w = jax.random.uniform(k_w, (fan_in, fan_out), jnp.float32, -bound, bound)
        b = jax.random.uniform(k_b, (fan_out,), jnp.float32, -bound, bound)
        return w, b

    keys = jax.random.split(key, n_hidden_layers + 2)
    params["linears"].append(_linear(keys[0], n_input, n_hidden))
    params["bns"].append((jnp.ones((n_hidden,), jnp.float32),
                          jnp.zeros((n_hidden,), jnp.float32)))
    for i in range(n_hidden_layers):
        params["linears"].append(_linear(keys[1 + i], n_hidden, n_hidden))
        params["bns"].append((jnp.ones((n_hidden,), jnp.float32),
                              jnp.zeros((n_hidden,), jnp.float32)))
    last_in = n_hidden + n_input if jump else n_hidden
    params["last"] = _linear(keys[-1], last_in, n_output)
    return params


# ----------------------------------------------------------------------------
# Pure-JAX reference (dropout=0 path) for correctness checking.  Mirrors the
# kernel's bf16-operand / f32-accumulation matmuls so the comparison checks
# kernel logic rather than bf16 rounding.
# ----------------------------------------------------------------------------
def mlp_reference(params, x, *, last_act=True, jump=False, eps=1e-5):
    def bdot(a, w):
        return jnp.dot(a.astype(jnp.bfloat16), jnp.asarray(w).astype(jnp.bfloat16),
                       preferred_element_type=jnp.float32)

    x = jnp.asarray(x, jnp.float32)
    inp = x
    for (w, b), (g, be) in zip(params["linears"], params["bns"]):
        x = jnp.maximum(bdot(x, w) + b, 0.0)
        mean = jnp.mean(x, axis=0, keepdims=True)
        var = jnp.maximum(jnp.mean(x * x, axis=0, keepdims=True) - mean * mean, 0.0)
        x = (x - mean) * jax.lax.rsqrt(var + eps) * g + be
        x = jnp.maximum(x, 0.0)
    if jump:
        x = jnp.concatenate([inp, x], axis=1)
    w, b = params["last"]
    x = bdot(x, w) + b
    if last_act:
        x = jnp.tanh(x)
    return x


# ----------------------------------------------------------------------------
if __name__ == "__main__":
    batch, n_input, n_hidden, n_output, n_hidden_layers = 8, 16, 32, 8, 2

    key = jax.random.PRNGKey(0)
    k_x, k_p = jax.random.split(key)
    x = jax.random.normal(k_x, (batch, n_input), jnp.float32)

    # --- deterministic path (dropout=0), compared against pure-JAX reference
    params = init_mlp_params(k_p, n_input, n_output, n_hidden,
                             n_hidden_layers, jump=False)
    prepared = prepare_mlp_params(params, jump=False)      # padded/bf16, cached

    out = mlp_forward(prepared, x, dropout=0.0, last_act=True)
    out = jax.block_until_ready(out)
    ref = mlp_reference(params, x, last_act=True, jump=False)
    assert out.shape == (batch, n_output)
    assert bool(jnp.all(jnp.isfinite(out)))
    assert bool(jnp.allclose(out, ref, atol=5e-2, rtol=5e-2)), "mismatch vs reference"

    # --- non-multiple-of-8 batch exercises the masked BatchNorm statistics
    #     (reuses the same cached padded params)
    x_small = x[:5]
    out_s = mlp_forward(prepared, x_small, dropout=0.0, last_act=True)
    out_s = jax.block_until_ready(out_s)
    ref_s = mlp_reference(params, x_small, last_act=True, jump=False)
    assert out_s.shape == (5, n_output)
    assert bool(jnp.allclose(out_s, ref_s, atol=5e-2, rtol=5e-2)), "mismatch (padded batch)"

    # --- exercise the dropout (hash PRNG) path and the jump (skip-connection) path
    params_j = init_mlp_params(k_p, n_input, n_output, n_hidden,
                               n_hidden_layers, jump=True)
    prepared_j = prepare_mlp_params(params_j, jump=True)
    out_j = mlp_forward(prepared_j, x, dropout=0.25, last_act=False, seed=123)
    out_j = jax.block_until_ready(out_j)
    assert out_j.shape == (batch, n_output)
    assert bool(jnp.all(jnp.isfinite(out_j)))

    print("KERNEL_OK")
</pallas_src>

<mosaic_0001>
module attributes {stable_mosaic.version = 11 : i64} {
  func.func @_mlp_fused_kernel(%arg0: memref<1xi32, #tpu.memory_space<smem>>, %arg1: memref<8x1xf32, #tpu.memory_space<vmem>>, %arg2: memref<8x128xf32, #tpu.memory_space<vmem>>, %arg3: memref<128x128xbf16, #tpu.memory_space<vmem>>, %arg4: memref<1x128xf32, #tpu.memory_space<vmem>>, %arg5: memref<1x128xf32, #tpu.memory_space<vmem>>, %arg6: memref<1x128xf32, #tpu.memory_space<vmem>>, %arg7: memref<128x128xbf16, #tpu.memory_space<vmem>>, %arg8: memref<1x128xf32, #tpu.memory_space<vmem>>, %arg9: memref<1x128xf32, #tpu.memory_space<vmem>>, %arg10: memref<1x128xf32, #tpu.memory_space<vmem>>, %arg11: memref<128x128xbf16, #tpu.memory_space<vmem>>, %arg12: memref<1x128xf32, #tpu.memory_space<vmem>>, %arg13: memref<1x128xf32, #tpu.memory_space<vmem>>, %arg14: memref<1x128xf32, #tpu.memory_space<vmem>>, %arg15: memref<128x128xbf16, #tpu.memory_space<vmem>>, %arg16: memref<1x128xf32, #tpu.memory_space<vmem>>, %arg17: memref<8x128xf32, #tpu.memory_space<vmem>>) attributes {dimension_semantics = [], scalar_prefetch = 0 : i64, scratch_operands = 0 : i64, tpu.core_type = #tpu.core_type<tc>} {
    %c0 = arith.constant 0 : index
    %c0_0 = arith.constant 0 : index
    %0 = vector.load %arg1[%c0, %c0_0] : memref<8x1xf32, #tpu.memory_space<vmem>>, vector<8x1xf32>
    %c0_1 = arith.constant 0 : index
    %c0_2 = arith.constant 0 : index
    %1 = vector.load %arg2[%c0_1, %c0_2] : memref<8x128xf32, #tpu.memory_space<vmem>>, vector<8x128xf32>
    %c0_3 = arith.constant 0 : index
    %c0_4 = arith.constant 0 : index
    %2 = vector.load %arg4[%c0_3, %c0_4] : memref<1x128xf32, #tpu.memory_space<vmem>>, vector<1x128xf32>
    %c0_5 = arith.constant 0 : index
    %c0_6 = arith.constant 0 : index
    %3 = vector.load %arg5[%c0_5, %c0_6] : memref<1x128xf32, #tpu.memory_space<vmem>>, vector<1x128xf32>
    %c0_7 = arith.constant 0 : index
    %c0_8 = arith.constant 0 : index
    %4 = vector.load %arg6[%c0_7, %c0_8] : memref<1x128xf32, #tpu.memory_space<vmem>>, vector<1x128xf32>
    %5 = arith.truncf %1 : vector<8x128xf32> to vector<8x128xbf16>
    %c0_9 = arith.constant 0 : index
    %c0_10 = arith.constant 0 : index
    %6 = vector.load %arg3[%c0_9, %c0_10] : memref<128x128xbf16, #tpu.memory_space<vmem>>, vector<128x128xbf16>
    %cst = arith.constant dense<0.000000e+00> : vector<8x128xf32>
    %7 = tpu.matmul %5, %6, %cst {dimension_numbers = #tpu.dot_dimension_numbers<[1], [0], [0], [1], [0, 0, 1, 1], [], []>} : vector<8x128xbf16>, vector<128x128xbf16>, vector<8x128xf32> -> vector<8x128xf32>
    %8 = vector.broadcast %2 : vector<1x128xf32> to vector<8x128xf32>
    %9 = arith.addf %7, %8 : vector<8x128xf32>
    %cst_11 = arith.constant 0.000000e+00 : f32
    %10 = vector.broadcast %cst_11 : f32 to vector<8x128xf32>
    %11 = arith.maximumf %9, %10 : vector<8x128xf32>
    %12 = vector.broadcast %0 : vector<8x1xf32> to vector<8x128xf32>
    %13 = arith.mulf %11, %12 : vector<8x128xf32>
    %cst_12 = arith.constant dense<0.000000e+00> : vector<128xf32>
    %14 = vector.multi_reduction <add>, %13, %cst_12 [0] : vector<8x128xf32> to vector<128xf32>
    %15 = vector.shape_cast %14 : vector<128xf32> to vector<1x128xf32>
    %16 = arith.mulf %13, %11 : vector<8x128xf32>
    %cst_13 = arith.constant dense<0.000000e+00> : vector<128xf32>
    %17 = vector.multi_reduction <add>, %16, %cst_13 [0] : vector<8x128xf32> to vector<128xf32>
    %18 = vector.shape_cast %17 : vector<128xf32> to vector<1x128xf32>
    %cst_14 = arith.constant 1.250000e-01 : f32
    %19 = vector.broadcast %cst_14 : f32 to vector<1x128xf32>
    %20 = arith.mulf %15, %19 : vector<1x128xf32>
    %cst_15 = arith.constant 1.250000e-01 : f32
    %21 = vector.broadcast %cst_15 : f32 to vector<1x128xf32>
    %22 = arith.mulf %18, %21 : vector<1x128xf32>
    %23 = arith.mulf %20, %20 : vector<1x128xf32>
    %24 = arith.subf %22, %23 : vector<1x128xf32>
    %cst_16 = arith.constant 0.000000e+00 : f32
    %25 = vector.broadcast %cst_16 : f32 to vector<1x128xf32>
    %26 = arith.maximumf %24, %25 : vector<1x128xf32>
    %27 = vector.broadcast %20 : vector<1x128xf32> to vector<8x128xf32>
    %28 = arith.subf %11, %27 : vector<8x128xf32>
    %cst_17 = arith.constant 9.99999974E-6 : f32
    %29 = vector.broadcast %cst_17 : f32 to vector<1x128xf32>
    %30 = arith.addf %26, %29 : vector<1x128xf32>
    %31 = math.rsqrt %30 : vector<1x128xf32>
    %32 = vector.broadcast %31 : vector<1x128xf32> to vector<8x128xf32>
    %33 = arith.mulf %28, %32 : vector<8x128xf32>
    %34 = vector.broadcast %3 : vector<1x128xf32> to vector<8x128xf32>
    %35 = arith.mulf %33, %34 : vector<8x128xf32>
    %36 = vector.broadcast %4 : vector<1x128xf32> to vector<8x128xf32>
    %37 = arith.addf %35, %36 : vector<8x128xf32>
    %cst_18 = arith.constant 0.000000e+00 : f32
    %38 = vector.broadcast %cst_18 : f32 to vector<8x128xf32>
    %39 = arith.maximumf %37, %38 : vector<8x128xf32>
    %c0_19 = arith.constant 0 : index
    %c0_20 = arith.constant 0 : index
    %40 = vector.load %arg8[%c0_19, %c0_20] : memref<1x128xf32, #tpu.memory_space<vmem>>, vector<1x128xf32>
    %c0_21 = arith.constant 0 : index
    %c0_22 = arith.constant 0 : index
    %41 = vector.load %arg9[%c0_21, %c0_22] : memref<1x128xf32, #tpu.memory_space<vmem>>, vector<1x128xf32>
    %c0_23 = arith.constant 0 : index
    %c0_24 = arith.constant 0 : index
    %42 = vector.load %arg10[%c0_23, %c0_24] : memref<1x128xf32, #tpu.memory_space<vmem>>, vector<1x128xf32>
    %43 = arith.truncf %39 : vector<8x128xf32> to vector<8x128xbf16>
    %c0_25 = arith.constant 0 : index
    %c0_26 = arith.constant 0 : index
    %44 = vector.load %arg7[%c0_25, %c0_26] : memref<128x128xbf16, #tpu.memory_space<vmem>>, vector<128x128xbf16>
    %cst_27 = arith.constant dense<0.000000e+00> : vector<8x128xf32>
    %45 = tpu.matmul %43, %44, %cst_27 {dimension_numbers = #tpu.dot_dimension_numbers<[1], [0], [0], [1], [0, 0, 1, 1], [], []>} : vector<8x128xbf16>, vector<128x128xbf16>, vector<8x128xf32> -> vector<8x128xf32>
    %46 = vector.broadcast %40 : vector<1x128xf32> to vector<8x128xf32>
    %47 = arith.addf %45, %46 : vector<8x128xf32>
    %cst_28 = arith.constant 0.000000e+00 : f32
    %48 = vector.broadcast %cst_28 : f32 to vector<8x128xf32>
    %49 = arith.maximumf %47, %48 : vector<8x128xf32>
    %50 = vector.broadcast %0 : vector<8x1xf32> to vector<8x128xf32>
    %51 = arith.mulf %49, %50 : vector<8x128xf32>
    %cst_29 = arith.constant dense<0.000000e+00> : vector<128xf32>
    %52 = vector.multi_reduction <add>, %51, %cst_29 [0] : vector<8x128xf32> to vector<128xf32>
    %53 = vector.shape_cast %52 : vector<128xf32> to vector<1x128xf32>
    %54 = arith.mulf %51, %49 : vector<8x128xf32>
    %cst_30 = arith.constant dense<0.000000e+00> : vector<128xf32>
    %55 = vector.multi_reduction <add>, %54, %cst_30 [0] : vector<8x128xf32> to vector<128xf32>
    %56 = vector.shape_cast %55 : vector<128xf32> to vector<1x128xf32>
    %cst_31 = arith.constant 1.250000e-01 : f32
    %57 = vector.broadcast %cst_31 : f32 to vector<1x128xf32>
    %58 = arith.mulf %53, %57 : vector<1x128xf32>
    %cst_32 = arith.constant 1.250000e-01 : f32
    %59 = vector.broadcast %cst_32 : f32 to vector<1x128xf32>
    %60 = arith.mulf %56, %59 : vector<1x128xf32>
    %61 = arith.mulf %58, %58 : vector<1x128xf32>
    %62 = arith.subf %60, %61 : vector<1x128xf32>
    %cst_33 = arith.constant 0.000000e+00 : f32
    %63 = vector.broadcast %cst_33 : f32 to vector<1x128xf32>
    %64 = arith.maximumf %62, %63 : vector<1x128xf32>
    %65 = vector.broadcast %58 : vector<1x128xf32> to vector<8x128xf32>
    %66 = arith.subf %49, %65 : vector<8x128xf32>
    %cst_34 = arith.constant 9.99999974E-6 : f32
    %67 = vector.broadcast %cst_34 : f32 to vector<1x128xf32>
    %68 = arith.addf %64, %67 : vector<1x128xf32>
    %69 = math.rsqrt %68 : vector<1x128xf32>
    %70 = vector.broadcast %69 : vector<1x128xf32> to vector<8x128xf32>
    %71 = arith.mulf %66, %70 : vector<8x128xf32>
    %72 = vector.broadcast %41 : vector<1x128xf32> to vector<8x128xf32>
    %73 = arith.mulf %71, %72 : vector<8x128xf32>
    %74 = vector.broadcast %42 : vector<1x128xf32> to vector<8x128xf32>
    %75 = arith.addf %73, %74 : vector<8x128xf32>
    %cst_35 = arith.constant 0.000000e+00 : f32
    %76 = vector.broadcast %cst_35 : f32 to vector<8x128xf32>
    %77 = arith.maximumf %75, %76 : vector<8x128xf32>
    %c0_36 = arith.constant 0 : index
    %c0_37 = arith.constant 0 : index
    %78 = vector.load %arg12[%c0_36, %c0_37] : memref<1x128xf32, #tpu.memory_space<vmem>>, vector<1x128xf32>
    %c0_38 = arith.constant 0 : index
    %c0_39 = arith.constant 0 : index
    %79 = vector.load %arg13[%c0_38, %c0_39] : memref<1x128xf32, #tpu.memory_space<vmem>>, vector<1x128xf32>
    %c0_40 = arith.constant 0 : index
    %c0_41 = arith.constant 0 : index
    %80 = vector.load %arg14[%c0_40, %c0_41] : memref<1x128xf32, #tpu.memory_space<vmem>>, vector<1x128xf32>
    %81 = arith.truncf %77 : vector<8x128xf32> to vector<8x128xbf16>
    %c0_42 = arith.constant 0 : index
    %c0_43 = arith.constant 0 : index
    %82 = vector.load %arg11[%c0_42, %c0_43] : memref<128x128xbf16, #tpu.memory_space<vmem>>, vector<128x128xbf16>
    %cst_44 = arith.constant dense<0.000000e+00> : vector<8x128xf32>
    %83 = tpu.matmul %81, %82, %cst_44 {dimension_numbers = #tpu.dot_dimension_numbers<[1], [0], [0], [1], [0, 0, 1, 1], [], []>} : vector<8x128xbf16>, vector<128x128xbf16>, vector<8x128xf32> -> vector<8x128xf32>
    %84 = vector.broadcast %78 : vector<1x128xf32> to vector<8x128xf32>
    %85 = arith.addf %83, %84 : vector<8x128xf32>
    %cst_45 = arith.constant 0.000000e+00 : f32
    %86 = vector.broadcast %cst_45 : f32 to vector<8x128xf32>
    %87 = arith.maximumf %85, %86 : vector<8x128xf32>
    %88 = vector.broadcast %0 : vector<8x1xf32> to vector<8x128xf32>
    %89 = arith.mulf %87, %88 : vector<8x128xf32>
    %cst_46 = arith.constant dense<0.000000e+00> : vector<128xf32>
    %90 = vector.multi_reduction <add>, %89, %cst_46 [0] : vector<8x128xf32> to vector<128xf32>
    %91 = vector.shape_cast %90 : vector<128xf32> to vector<1x128xf32>
    %92 = arith.mulf %89, %87 : vector<8x128xf32>
    %cst_47 = arith.constant dense<0.000000e+00> : vector<128xf32>
    %93 = vector.multi_reduction <add>, %92, %cst_47 [0] : vector<8x128xf32> to vector<128xf32>
    %94 = vector.shape_cast %93 : vector<128xf32> to vector<1x128xf32>
    %cst_48 = arith.constant 1.250000e-01 : f32
    %95 = vector.broadcast %cst_48 : f32 to vector<1x128xf32>
    %96 = arith.mulf %91, %95 : vector<1x128xf32>
    %cst_49 = arith.constant 1.250000e-01 : f32
    %97 = vector.broadcast %cst_49 : f32 to vector<1x128xf32>
    %98 = arith.mulf %94, %97 : vector<1x128xf32>
    %99 = arith.mulf %96, %96 : vector<1x128xf32>
    %100 = arith.subf %98, %99 : vector<1x128xf32>
    %cst_50 = arith.constant 0.000000e+00 : f32
    %101 = vector.broadcast %cst_50 : f32 to vector<1x128xf32>
    %102 = arith.maximumf %100, %101 : vector<1x128xf32>
    %103 = vector.broadcast %96 : vector<1x128xf32> to vector<8x128xf32>
    %104 = arith.subf %87, %103 : vector<8x128xf32>
    %cst_51 = arith.constant 9.99999974E-6 : f32
    %105 = vector.broadcast %cst_51 : f32 to vector<1x128xf32>
    %106 = arith.addf %102, %105 : vector<1x128xf32>
    %107 = math.rsqrt %106 : vector<1x128xf32>
    %108 = vector.broadcast %107 : vector<1x128xf32> to vector<8x128xf32>
    %109 = arith.mulf %104, %108 : vector<8x128xf32>
    %110 = vector.broadcast %79 : vector<1x128xf32> to vector<8x128xf32>
    %111 = arith.mulf %109, %110 : vector<8x128xf32>
    %112 = vector.broadcast %80 : vector<1x128xf32> to vector<8x128xf32>
    %113 = arith.addf %111, %112 : vector<8x128xf32>
    %cst_52 = arith.constant 0.000000e+00 : f32
    %114 = vector.broadcast %cst_52 : f32 to vector<8x128xf32>
    %115 = arith.maximumf %113, %114 : vector<8x128xf32>
    %c0_53 = arith.constant 0 : index
    %c0_54 = arith.constant 0 : index
    %116 = vector.load %arg16[%c0_53, %c0_54] : memref<1x128xf32, #tpu.memory_space<vmem>>, vector<1x128xf32>
    %117 = arith.truncf %115 : vector<8x128xf32> to vector<8x128xbf16>
    %c0_55 = arith.constant 0 : index
    %c0_56 = arith.constant 0 : index
    %118 = vector.load %arg15[%c0_55, %c0_56] : memref<128x128xbf16, #tpu.memory_space<vmem>>, vector<128x128xbf16>
    %cst_57 = arith.constant dense<0.000000e+00> : vector<8x128xf32>
    %119 = tpu.matmul %117, %118, %cst_57 {dimension_numbers = #tpu.dot_dimension_numbers<[1], [0], [0], [1], [0, 0, 1, 1], [], []>} : vector<8x128xbf16>, vector<128x128xbf16>, vector<8x128xf32> -> vector<8x128xf32>
    %120 = vector.broadcast %116 : vector<1x128xf32> to vector<8x128xf32>
    %121 = arith.addf %119, %120 : vector<8x128xf32>
    %122 = math.tanh %121 : vector<8x128xf32>
    %c0_58 = arith.constant 0 : index
    %c0_59 = arith.constant 0 : index
    %123 = vector.load %arg17[%c0_58, %c0_59] : memref<8x128xf32, #tpu.memory_space<vmem>>, vector<8x128xf32>
    tpu.vector_store %arg17[%c0_58, %c0_59], %122 {strides = array<i32>} : memref<8x128xf32, #tpu.memory_space<vmem>>, vector<8x128xf32>,
    return
  }
}

</mosaic_0001>

<bundles_post_ra>
// kernel: tpu_custom_call.1
= control target key start
LH: loop header
LB: loop body
LE: loop exit
PB: predicated region body
PF: predicated region fallthrough
CT: control target
= control target key end

     0   :  { %s1675_s0 = inlined_call_operand.<no memory space> [shape: s32[1], index: 0, kind: input, shape index: {}]   ;;  %s1676_s1 = inlined_call_operand.vmem [shape: f32[8,1], index: 1, kind: input, shape index: {}]   ;;  %s1677_s2 = inlined_call_operand.hbm [shape: f32[8,128], index: 2, kind: input, shape index: {}]   ;;  %s1678_s3 = inlined_call_operand.hbm [shape: bf16[128,128], index: 3, kind: input, shape index: {}]   ;;  %s1679_s4 = inlined_call_operand.vmem [shape: f32[1,128], index: 4, kind: input, shape index: {}]   ;;  %s1680_s5 = inlined_call_operand.hbm [shape: f32[1,128], index: 5, kind: input, shape index: {}]   ;;  %s1681_s6 = inlined_call_operand.hbm [shape: f32[1,128], index: 6, kind: input, shape index: {}]   ;;  %s1682_s7 = inlined_call_operand.hbm [shape: bf16[128,128], index: 7, kind: input, shape index: {}]   ;;  %s1683_s8 = inlined_call_operand.hbm [shape: f32[1,128], index: 8, kind: input, shape index: {}]   ;;  %s1684_s9 = inlined_call_operand.hbm [shape: f32[1,128], index: 9, kind: input, shape index: {}]   ;;  %s1685_s10 = inlined_call_operand.hbm [shape: f32[1,128], index: 10, kind: input, shape index: {}]   ;;  %s1686_s11 = inlined_call_operand.hbm [shape: bf16[128,128], index: 11, kind: input, shape index: {}]   ;;  %s1687_s12 = inlined_call_operand.hbm [shape: f32[1,128], index: 12, kind: input, shape index: {}]   ;;  %s1688_s13 = inlined_call_operand.hbm [shape: f32[1,128], index: 13, kind: input, shape index: {}]   ;;  %s1689_s14 = inlined_call_operand.hbm [shape: f32[1,128], index: 14, kind: input, shape index: {}]   ;;  %s1690_s15 = inlined_call_operand.vmem [shape: bf16[128,128], index: 15, kind: input, shape index: {}]   ;;  %s1691_s16 = inlined_call_operand.vmem [shape: f32[1,128], index: 16, kind: input, shape index: {}]   ;;  %s1692_s17 = inlined_call_operand.hbm [shape: f32[8,128], index: 17, kind: output, shape index: {}]  }
   0x1   :  { %1694 = sst [smem:[#allocation32_spill]] %s1676_s1 }
   0x2   :  { %1695 = sst [smem:[#allocation33_spill]] %s1692_s17 }
   0x3   :  { %23 = vsyncpa [#allocation4], 0 }
   0x4   :  { %24 = vsyncpa [#allocation7], 0 }
   0x5   :  { %25 = vsyncpa [#allocation10], 0 }
   0x6   :  { %26 = vsyncpa [#allocation13], 0 }
   0x7   :  { %27 = vsyncpa [#allocation16], 0 }
   0x8   :  { %28 = vsyncpa [#allocation19], 0 }
   0x9   :  { %29 = vsyncpa [#allocation22], 0 }
   0xa   :  { %30 = vsyncpa [#allocation5], 0  ;;  %s1324_s24 = smov [#allocation6]   ;;  %s1022_s28 = scalar_lea.hbm %s1678_s3, 1024 }
   0xb   :  { %s50_s25 = sshll.u32 %s1324_s24, 4  ;;  %p1023_p0 = scmp.ne.s32.totalorder %s1678_s3, %s1022_s28  ;;  %s51_s25 = int_to_ptr.vmem [resolvable:$true] %s50_s25 }
   0xc   :  { %p1026_p1 = scmp.lt.u32.totalorder %s1022_s28, %s1678_s3 }
   0xe   :  { %p1028_p2 = pnand %p1026_p1, %p1023_p0 }
  0x10   :  { %1031 = shalt.err (!%p1028_p2)
}
  0x11   :  { %s1032_s19 = scalar_lea.vmem %s51_s25, 1024  ;;  %p1037_p4 = scmp.lt.s32.totalorder %s51_s25, %s51_s25 }
  0x12   :  { %p1033_p3 = scmp.ne.s32.totalorder %s51_s25, %s1032_s19  ;;  %p1038_p5 = scmp.lt.s32.totalorder %s1032_s19, %s1032_s19 }
  0x14   :  { %p1039_p6 = por %p1038_p5, %p1037_p4 }
  0x16   :  { %p1040_p7 = pnand %p1039_p6, %p1033_p3 }
  0x18   :  { %1043 = shalt.err (!%p1040_p7)
}
  0x19   :  { %s1325_s1 = smov 64   ;;  %s1326_s20 = smov 4  }
  0x1a   :  { %56 = dma.hbm_to_vmem [thread:$0]  %s1678_s3, 1024, %s51_s25, [#allocation7], %s1325_s1, %s1325_s1, %s1326_s20  }
  0x1b   :  { %s1327_s23 = smov [#allocation9]   ;;  %s1328_s26 = smov [#allocation12]  }
  0x1c   :  { %s75_s24 = sshll.u32 %s1327_s23, 4  ;;  %s97_s27 = sshll.u32 %s1328_s26, 4  ;;  %s76_s24 = int_to_ptr.vmem [resolvable:$true] %s75_s24  ;;  %s98_s27 = int_to_ptr.vmem [resolvable:$true] %s97_s27 }
  0x1d   :  { %s1044_s30 = scalar_lea.hbm %s1681_s6, 16 }
  0x1e   :  { %p1045_p8 = scmp.ne.s32.totalorder %s1681_s6, %s1044_s30  ;;  %p1048_p9 = scmp.lt.u32.totalorder %s1044_s30, %s1681_s6 }
  0x20   :  { %p1050_p10 = pnand %p1048_p9, %p1045_p8 }
  0x22   :  { %1053 = shalt.err (!%p1050_p10)
}
  0x23   :  { %s1054_s3 = scalar_lea.vmem %s76_s24, 16  ;;  %s1058_s25 = scalar_lea.vmem %s76_s24, 32 }
  0x24   :  { %p1055_p11 = scmp.ne.s32.totalorder %s76_s24, %s1054_s3  ;;  %p1059_p12 = scmp.lt.s32.totalorder %s76_s24, %s76_s24 }
  0x25   :  { %p1060_p13 = scmp.lt.s32.totalorder %s1058_s25, %s1054_s3 }
  0x27   :  { %p1061_p0 = por %p1060_p13, %p1059_p12 }
  0x29   :  { %p1062_p1 = pnand %p1061_p0, %p1055_p11 }
  0x2b   :  { %1065 = shalt.err (!%p1062_p1)
}
  0x2c   :  { %78 = dma.hbm_to_vmem [thread:$0]  %s1681_s6, 16, %s76_s24, [#allocation10]  }
  0x2d   :  { %s1066_s17 = scalar_lea.hbm %s1683_s8, 16 }
  0x2e   :  { %p1067_p2 = scmp.ne.s32.totalorder %s1683_s8, %s1066_s17  ;;  %p1070_p3 = scmp.lt.u32.totalorder %s1066_s17, %s1683_s8 }
  0x30   :  { %p1072_p4 = pnand %p1070_p3, %p1067_p2 }
  0x32   :  { %1075 = shalt.err (!%p1072_p4)
}
  0x33   :  { %s1076_s18 = scalar_lea.vmem %s98_s27, 16  ;;  %s1080_s19 = scalar_lea.vmem %s98_s27, 32 }
  0x34   :  { %p1077_p5 = scmp.ne.s32.totalorder %s98_s27, %s1076_s18  ;;  %p1081_p6 = scmp.lt.s32.totalorder %s98_s27, %s98_s27 }
  0x35   :  { %p1082_p7 = scmp.lt.s32.totalorder %s1080_s19, %s1076_s18 }
  0x37   :  { %p1083_p8 = por %p1082_p7, %p1081_p6 }
  0x39   :  { %p1084_p9 = pnand %p1083_p8, %p1077_p5 }
  0x3b   :  { %1087 = shalt.err (!%p1084_p9)
}
  0x3c   :  { %100 = dma.hbm_to_vmem [thread:$0]  %s1683_s8, 16, %s98_s27, [#allocation13]  }
  0x3d   :  { %s1329_s3 = smov [#allocation15]   ;;  %s1330_s21 = smov [#allocation18]  }
  0x3e   :  { %s117_s25 = sshll.u32 %s1329_s3, 4  ;;  %s139_s22 = sshll.u32 %s1330_s21, 4  ;;  %s118_s25 = int_to_ptr.vmem [resolvable:$true] %s117_s25  ;;  %s140_s22 = int_to_ptr.vmem [resolvable:$true] %s139_s22 }
  0x3f   :  { %s1088_s17 = scalar_lea.hbm %s1685_s10, 16 }
  0x40   :  { %p1089_p10 = scmp.ne.s32.totalorder %s1685_s10, %s1088_s17  ;;  %p1092_p11 = scmp.lt.u32.totalorder %s1088_s17, %s1685_s10 }
  0x42   :  { %p1094_p12 = pnand %p1092_p11, %p1089_p10 }
  0x44   :  { %1097 = shalt.err (!%p1094_p12)
}
  0x45   :  { %s1098_s8 = scalar_lea.vmem %s118_s25, 16  ;;  %s1102_s27 = scalar_lea.vmem %s118_s25, 32 }
  0x46   :  { %p1099_p13 = scmp.ne.s32.totalorder %s118_s25, %s1098_s8  ;;  %p1103_p0 = scmp.lt.s32.totalorder %s118_s25, %s118_s25 }
  0x47   :  { %p1104_p1 = scmp.lt.s32.totalorder %s1102_s27, %s1098_s8 }
  0x49   :  { %p1105_p2 = por %p1104_p1, %p1103_p0 }
  0x4b   :  { %p1106_p3 = pnand %p1105_p2, %p1099_p13 }
  0x4d   :  { %1109 = shalt.err (!%p1106_p3)
}
  0x4e   :  { %120 = dma.hbm_to_vmem [thread:$0]  %s1685_s10, 16, %s118_s25, [#allocation16]  }
  0x4f   :  { %s1110_s3 = scalar_lea.hbm %s1687_s12, 16 }
  0x50   :  { %p1111_p4 = scmp.ne.s32.totalorder %s1687_s12, %s1110_s3  ;;  %p1114_p5 = scmp.lt.u32.totalorder %s1110_s3, %s1687_s12 }
  0x52   :  { %p1116_p6 = pnand %p1114_p5, %p1111_p4 }
  0x54   :  { %1119 = shalt.err (!%p1116_p6)
}
  0x55   :  { %s1120_s28 = scalar_lea.vmem %s140_s22, 16  ;;  %s1124_s29 = scalar_lea.vmem %s140_s22, 32 }
  0x56   :  { %p1121_p7 = scmp.ne.s32.totalorder %s140_s22, %s1120_s28  ;;  %p1125_p8 = scmp.lt.s32.totalorder %s140_s22, %s140_s22 }
  0x57   :  { %p1126_p9 = scmp.lt.s32.totalorder %s1124_s29, %s1120_s28 }
  0x59   :  { %p1127_p10 = por %p1126_p9, %p1125_p8 }
  0x5b   :  { %p1128_p11 = pnand %p1127_p10, %p1121_p7 }
  0x5d   :  { %1131 = shalt.err (!%p1128_p11)
}
  0x5e   :  { %142 = dma.hbm_to_vmem [thread:$0]  %s1687_s12, 16, %s140_s22, [#allocation19]  }
  0x5f   :  { %s1331_s30 = smov [#allocation3]   ;;  %s1332_s8 = smov [#allocation8]  }
  0x60   :  { %s41_s0 = sshll.u32 %s1331_s30, 4  ;;  %s65_s27 = sshll.u32 %s1332_s8, 4  ;;  %s42_s0 = int_to_ptr.vmem [resolvable:$true] %s41_s0  ;;  %s66_s27 = int_to_ptr.vmem [resolvable:$true] %s65_s27 }
  0x61   :  { %s1132_s6 = scalar_lea.hbm %s1677_s2, 128 }
  0x62   :  { %p1133_p12 = scmp.ne.s32.totalorder %s1677_s2, %s1132_s6  ;;  %p1136_p13 = scmp.lt.u32.totalorder %s1132_s6, %s1677_s2 }
  0x64   :  { %p1138_p0 = pnand %p1136_p13, %p1133_p12 }
  0x66   :  { %1141 = shalt.err (!%p1138_p0)
}
  0x67   :  { %s1142_s12 = scalar_lea.vmem %s42_s0, 128  ;;  %p1147_p2 = scmp.lt.s32.totalorder %s42_s0, %s42_s0 }
  0x68   :  { %p1143_p1 = scmp.ne.s32.totalorder %s42_s0, %s1142_s12  ;;  %p1148_p3 = scmp.lt.s32.totalorder %s1142_s12, %s1142_s12 }
  0x6a   :  { %p1149_p4 = por %p1148_p3, %p1147_p2 }
  0x6c   :  { %p1150_p5 = pnand %p1149_p4, %p1143_p1 }
  0x6e   :  { %1153 = shalt.err (!%p1150_p5)
}
  0x6f   :  { %44 = dma.hbm_to_vmem [thread:$0]  %s1677_s2, 128, %s42_s0, [#allocation4]  }
  0x70   :  { %s1154_s29 = scalar_lea.hbm %s1680_s5, 16 }
  0x71   :  { %p1155_p6 = scmp.ne.s32.totalorder %s1680_s5, %s1154_s29  ;;  %p1158_p7 = scmp.lt.u32.totalorder %s1154_s29, %s1680_s5 }
  0x73   :  { %p1160_p8 = pnand %p1158_p7, %p1155_p6 }
  0x75   :  { %1163 = shalt.err (!%p1160_p8)
}
  0x76   :  { %s1164_s18 = scalar_lea.vmem %s66_s27, 16  ;;  %s1168_s19 = scalar_lea.vmem %s66_s27, 32 }
  0x77   :  { %p1165_p9 = scmp.ne.s32.totalorder %s66_s27, %s1164_s18  ;;  %p1169_p10 = scmp.lt.s32.totalorder %s66_s27, %s66_s27 }
  0x78   :  { %p1170_p11 = scmp.lt.s32.totalorder %s1168_s19, %s1164_s18 }
  0x7a   :  { %p1171_p12 = por %p1170_p11, %p1169_p10 }
  0x7c   :  { %p1172_p13 = pnand %p1171_p12, %p1165_p9 }
  0x7e   :  { %1175 = shalt.err (!%p1172_p13)
}
  0x7f   :  { %68 = dma.hbm_to_vmem [thread:$0]  %s1680_s5, 16, %s66_s27, [#allocation7]  }
  0x80   :  { %s1333_s6 = smov [#allocation11]   ;;  %s1334_s3 = smov [#allocation14]  }
  0x81   :  { %s84_s24 = sshll.u32 %s1333_s6, 4  ;;  %s107_s21 = sshll.u32 %s1334_s3, 4  ;;  %s85_s24 = int_to_ptr.vmem [resolvable:$true] %s84_s24  ;;  %s108_s21 = int_to_ptr.vmem [resolvable:$true] %s107_s21 }
  0x82   :  { %s1176_s22 = scalar_lea.hbm %s1682_s7, 1024 }
  0x83   :  { %p1177_p0 = scmp.ne.s32.totalorder %s1682_s7, %s1176_s22  ;;  %p1180_p1 = scmp.lt.u32.totalorder %s1176_s22, %s1682_s7 }
  0x85   :  { %p1182_p2 = pnand %p1180_p1, %p1177_p0 }
  0x87   :  { %1185 = shalt.err (!%p1182_p2)
}
  0x88   :  { %s1186_s5 = scalar_lea.vmem %s85_s24, 1024  ;;  %p1191_p4 = scmp.lt.s32.totalorder %s85_s24, %s85_s24 }
  0x89   :  { %p1187_p3 = scmp.ne.s32.totalorder %s85_s24, %s1186_s5  ;;  %p1192_p5 = scmp.lt.s32.totalorder %s1186_s5, %s1186_s5 }
  0x8b   :  { %p1193_p6 = por %p1192_p5, %p1191_p4 }
  0x8d   :  { %p1194_p7 = pnand %p1193_p6, %p1187_p3 }
  0x8f   :  { %1197 = shalt.err (!%p1194_p7)
}
  0x90   :  { %90 = dma.hbm_to_vmem [thread:$0]  %s1682_s7, 1024, %s85_s24, [#allocation10], %s1325_s1, %s1325_s1, %s1326_s20  }
  0x91   :  { %s1198_s8 = scalar_lea.hbm %s1684_s9, 16 }
  0x92   :  { %p1199_p8 = scmp.ne.s32.totalorder %s1684_s9, %s1198_s8  ;;  %p1202_p9 = scmp.lt.u32.totalorder %s1198_s8, %s1684_s9 }
  0x94   :  { %p1204_p10 = pnand %p1202_p9, %p1199_p8 }
  0x96   :  { %1207 = shalt.err (!%p1204_p10)
}
  0x97   :  { %s1208_s6 = scalar_lea.vmem %s108_s21, 16  ;;  %s1212_s3 = scalar_lea.vmem %s108_s21, 32 }
  0x98   :  { %p1209_p11 = scmp.ne.s32.totalorder %s108_s21, %s1208_s6  ;;  %p1213_p12 = scmp.lt.s32.totalorder %s108_s21, %s108_s21 }
  0x99   :  { %p1214_p13 = scmp.lt.s32.totalorder %s1212_s3, %s1208_s6 }
  0x9b   :  { %p1215_p0 = por %p1214_p13, %p1213_p12 }
  0x9d   :  { %p1216_p1 = pnand %p1215_p0, %p1209_p11 }
  0x9f   :  { %1219 = shalt.err (!%p1216_p1)
}
  0xa0   :  { %110 = dma.hbm_to_vmem [thread:$0]  %s1684_s9, 16, %s108_s21, [#allocation13]  }
  0xa1   :  { %s1335_s23 = smov [#allocation17]   ;;  %s1336_s22 = smov [#allocation20]  }
  0xa2   :  { %s126_s12 = sshll.u32 %s1335_s23, 4  ;;  %s149_s26 = sshll.u32 %s1336_s22, 4  ;;  %s127_s12 = int_to_ptr.vmem [resolvable:$true] %s126_s12  ;;  %s150_s26 = int_to_ptr.vmem [resolvable:$true] %s149_s26 }
  0xa3   :  { %s1220_s29 = scalar_lea.hbm %s1686_s11, 1024 }
  0xa4   :  { %p1221_p2 = scmp.ne.s32.totalorder %s1686_s11, %s1220_s29  ;;  %p1224_p3 = scmp.lt.u32.totalorder %s1220_s29, %s1686_s11 }
  0xa6   :  { %p1226_p4 = pnand %p1224_p3, %p1221_p2 }
  0xa8   :  { %1229 = shalt.err (!%p1226_p4)
}
  0xa9   :  { %s1230_s9 = scalar_lea.vmem %s127_s12, 1024  ;;  %p1235_p6 = scmp.lt.s32.totalorder %s127_s12, %s127_s12 }
  0xaa   :  { %p1231_p5 = scmp.ne.s32.totalorder %s127_s12, %s1230_s9  ;;  %p1236_p7 = scmp.lt.s32.totalorder %s1230_s9, %s1230_s9 }
  0xac   :  { %p1237_p8 = por %p1236_p7, %p1235_p6 }
  0xae   :  { %p1238_p9 = pnand %p1237_p8, %p1231_p5 }
  0xb0   :  { %1241 = shalt.err (!%p1238_p9)
}
  0xb1   :  { %132 = dma.hbm_to_vmem [thread:$0]  %s1686_s11, 1024, %s127_s12, [#allocation16], %s1325_s1, %s1325_s1, %s1326_s20  }
  0xb2   :  { %s1242_s19 = scalar_lea.hbm %s1688_s13, 16 }
  0xb3   :  { %p1243_p10 = scmp.ne.s32.totalorder %s1688_s13, %s1242_s19  ;;  %p1246_p11 = scmp.lt.u32.totalorder %s1242_s19, %s1688_s13 }
  0xb5   :  { %p1248_p12 = pnand %p1246_p11, %p1243_p10 }
  0xb7   :  { %1251 = shalt.err (!%p1248_p12)
}
  0xb8   :  { %s1252_s7 = scalar_lea.vmem %s150_s26, 16  ;;  %s1256_s24 = scalar_lea.vmem %s150_s26, 32 }
  0xb9   :  { %p1253_p13 = scmp.ne.s32.totalorder %s150_s26, %s1252_s7  ;;  %p1257_p0 = scmp.lt.s32.totalorder %s150_s26, %s150_s26 }
  0xba   :  { %p1258_p1 = scmp.lt.s32.totalorder %s1256_s24, %s1252_s7 }
  0xbc   :  { %p1259_p2 = por %p1258_p1, %p1257_p0 }
  0xbe   :  { %p1260_p3 = pnand %p1259_p2, %p1253_p13 }
  0xc0   :  { %1263 = shalt.err (!%p1260_p3)
}
  0xc1   :  { %152 = dma.hbm_to_vmem [thread:$0]  %s1688_s13, 16, %s150_s26, [#allocation19]  }
  0xc2   :  { %s1337_s20 = smov [#allocation21]   ;;  %s1264_s17 = scalar_lea.hbm %s1689_s14, 16 }
  0xc3   :  { %s159_s23 = sshll.u32 %s1337_s20, 4  ;;  %p1265_p4 = scmp.ne.s32.totalorder %s1689_s14, %s1264_s17  ;;  %s160_s23 = int_to_ptr.vmem [resolvable:$true] %s159_s23 }
  0xc4   :  { %p1268_p5 = scmp.lt.u32.totalorder %s1264_s17, %s1689_s14 }
  0xc6   :  { %p1270_p6 = pnand %p1268_p5, %p1265_p4 }
  0xc8   :  { %1273 = shalt.err (!%p1270_p6)
}
  0xc9   :  { %s1274_s10 = scalar_lea.vmem %s160_s23, 16  ;;  %s1278_s13 = scalar_lea.vmem %s160_s23, 32 }
  0xca   :  { %p1275_p7 = scmp.ne.s32.totalorder %s160_s23, %s1274_s10  ;;  %p1279_p8 = scmp.lt.s32.totalorder %s160_s23, %s160_s23 }
  0xcb   :  { %p1280_p9 = scmp.lt.s32.totalorder %s1278_s13, %s1274_s10 }
  0xcd   :  { %p1281_p10 = por %p1280_p9, %p1279_p8 }
  0xcf   :  { %p1282_p11 = pnand %p1281_p10, %p1275_p7 }
  0xd1   :  { %1285 = shalt.err (!%p1282_p11)
}
  0xd2   :  { %162 = dma.hbm_to_vmem [thread:$0]  %s1689_s14, 16, %s160_s23, [#allocation22]  }
  0xd3   :  { %1308 = dma.done.wait [#allocation4], 128  }
  0xd4   :  { %1309 = vsyncadd [#allocation4], 4294967168 }
  0xd5   :  { %1310 = dma.done.wait [#allocation7], 1040  }
  0xd6   :  { %1311 = vsyncadd [#allocation7], 4294966256 }
  0xd7   :  { %1312 = dma.done.wait [#allocation10], 1040  }
  0xd8   :  { %1313 = vsyncadd [#allocation10], 4294966256 }
  0xd9   :  { %1314 = dma.done.wait [#allocation13], 32  }
  0xda   :  { %1315 = vsyncadd [#allocation13], 4294967264 }
  0xdb   :  { %1316 = dma.done.wait [#allocation16], 1040  }
  0xdc   :  { %1317 = vsyncadd [#allocation16], 4294966256 }
  0xdd   :  { %1318 = dma.done.wait [#allocation19], 32  }
  0xde   :  { %1319 = vsyncadd [#allocation19], 4294967264 }
  0xdf   :  { %1320 = dma.done.wait [#allocation22], 16  }
  0xe0   :  { %1321 = vsyncadd [#allocation22], 4294967280  ;;  %v1338_v0 = vmov 0.0   ;;  %vm1339_vm0 = vmmov 0   ;;  %v1340_v1 = vmov 0   ;;  %v982_v2 = vld [vmem:[#allocation6] sm:$0xff]  }
  0xe1   :  { %883 = vmatprep.subr.bf16.mxu0 %v1338_v0  ;;  %899 = vmatprep.mubr.msk.bf16.mxu0 %vm1339_vm0, %v1338_v0  ;;  %v983_v3 = vld [vmem:[#allocation6 + $0x8] sm:$0xff]   ;;  %v984_v4 = vld [vmem:[#allocation6 + $0x10] sm:$0xff]   ;;  %v985_v5 = vld [vmem:[#allocation6 + $0x18] sm:$0xff]   ;;  %s1696_s21 = sld [smem:[#allocation32_spill]]  ;;  %s1341_s29 = smov [#allocation23]  }
  0xe2   :  { %981 = vset.pattern.permute.xlu0 %v1340_v1  ;;  %903 = vmatprep.subr.bf16.mxu1 %v1338_v0  ;;  %v986_v7 = vld [vmem:[#allocation6 + $0x20] sm:$0xff]   ;;  %v987_v8 = vld [vmem:[#allocation6 + $0x28] sm:$0xff]   ;;  %v988_v9 = vld [vmem:[#allocation6 + $0x30] sm:$0xff]   ;;  %s790_s5 = sshll.u32 %s1341_s29, 4  ;;  %s791_s5 = int_to_ptr.vmem [resolvable:$true] %s790_s5 }
  0xe3   :  { %919 = vmatprep.mubr.msk.bf16.mxu1 %vm1339_vm0, %v1338_v0  ;;  %884 = vmatpush3.bf16.msra.mxu0 %v982_v2  ;;  %v989_v10 = vld [vmem:[#allocation6 + $0x38] sm:$0xff]   ;;  %v990_v13 = vld [vmem:[#allocation11] sm:$0xff]   ;;  %v991_v14 = vld [vmem:[#allocation11 + $0x8] sm:$0xff]   ;;  %s1286_s27 = scalar_lea.vmem %s791_s5, 128  ;;  %p1291_p13 = scmp.lt.s32.totalorder %s791_s5, %s791_s5 }
  0xe4   :  { %885 = vmatprep.subr.bf16.mxu0 %v1338_v0  ;;  %v205_v11 = vld [vmem:[#allocation3] sm:$0xff]  ;;  %904 = vmatpush3.bf16.msra.mxu1 %v990_v13  ;;  %v994_v17 = vld [vmem:[#allocation11 + $0x20] sm:$0xff]   ;;  %v995_v18 = vld [vmem:[#allocation11 + $0x28] sm:$0xff]   ;;  %p1287_p12 = scmp.ne.s32.totalorder %s791_s5, %s1286_s27  ;;  %p1292_p0 = scmp.lt.s32.totalorder %s1286_s27, %s1286_s27 }
  0xe5   :  { %v209_v12 = vpack.c.bf16 %v205_v11, %v205_v11  ;;  %905 = vmatprep.subr.bf16.mxu1 %v1338_v0  ;;  %v992_v15 = vld [vmem:[#allocation11 + $0x10] sm:$0xff]   ;;  %v993_v16 = vld [vmem:[#allocation11 + $0x18] sm:$0xff]   ;;  %v998_v58 = vld [vmem:[#allocation17] sm:$0xff]  }
  0xe6   :  { %v996_v19 = vld [vmem:[#allocation11 + $0x30] sm:$0xff]   ;;  %v997_v20 = vld [vmem:[#allocation11 + $0x38] sm:$0xff]   ;;  %v1002_v62 = vld [vmem:[#allocation17 + $0x20] sm:$0xff]   ;;  %p1293_p1 = por %p1292_p0, %p1291_p13 }
  0xe7   :  { %886 = vmatpush3.bf16.msra.mxu0 %v983_v3  ;;  %v204_v6 = vld [vmem:[%s1696_s21] sm:$0xff]  ;;  %v814_v51 = vld [vmem:[#allocation8] ss:$0 sm:$0xff]  ;;  %v815_v53 = vld [vmem:[#allocation9] ss:$0 sm:$0xff] }
  0xe8   :  { %887 = vmatprep.subr.bf16.mxu0 %v1338_v0  ;;  %323 = vperm.xlu0 %981, %v204_v6   ;;  %v805_v21 = vld [vmem:[%s1679_s4] ss:$0 sm:$0xff]  ;;  %v1000_v60 = vld [vmem:[#allocation17 + $0x10] sm:$0xff]   ;;  %v1001_v61 = vld [vmem:[#allocation17 + $0x18] sm:$0xff]   ;;  %p1294_p2 = pnand %p1293_p1, %p1287_p12 }
  0xe9   :  { %906 = vmatpush3.bf16.msra.mxu1 %v991_v14  ;;  %v999_v59 = vld [vmem:[#allocation17 + $0x8] sm:$0xff]   ;;  %v1004_v1 = vld [vmem:[#allocation17 + $0x30] sm:$0xff]   ;;  %v1005_v2 = vld [vmem:[#allocation17 + $0x38] sm:$0xff]  }
  0xea   :  { %907 = vmatprep.subr.bf16.mxu1 %v1338_v0  ;;  %v1003_v63 = vld [vmem:[#allocation17 + $0x28] sm:$0xff]   ;;  %v816_v3 = vld [vmem:[#allocation12] ss:$0 sm:$0xff] }
  0xeb   :  { %888 = vmatpush3.bf16.msra.mxu0 %v984_v4 }
  0xec   :  { %889 = vmatprep.subr.bf16.mxu0 %v1338_v0 }
  0xed   :  { %908 = vmatpush3.bf16.msra.mxu1 %v992_v15 }
  0xee   :  { %909 = vmatprep.subr.bf16.mxu1 %v1338_v0 }
  0xef   :  { %890 = vmatpush3.bf16.msra.mxu0 %v985_v5 }
  0xf0   :  { %891 = vmatprep.subr.bf16.mxu0 %v1338_v0 }
  0xf1   :  { %910 = vmatpush3.bf16.msra.mxu1 %v993_v16 }
  0xf2   :  { %911 = vmatprep.subr.bf16.mxu1 %v1338_v0 }
  0xf3   :  { %892 = vmatpush3.bf16.msra.mxu0 %v986_v7 }
  0xf4   :  { %893 = vmatprep.subr.bf16.mxu0 %v1338_v0 }
  0xf5   :  { %912 = vmatpush3.bf16.msra.mxu1 %v994_v17 }
  0xf6   :  { %913 = vmatprep.subr.bf16.mxu1 %v1338_v0 }
  0xf7   :  { %894 = vmatpush3.bf16.msra.mxu0 %v987_v8 }
  0xf8   :  { %895 = vmatprep.subr.bf16.mxu0 %v1338_v0 }
  0xf9   :  { %914 = vmatpush3.bf16.msra.mxu1 %v995_v18 }
  0xfa   :  { %915 = vmatprep.subr.bf16.mxu1 %v1338_v0 }
  0xfb   :  { %896 = vmatpush3.bf16.msra.mxu0 %v988_v9 }
  0xfc   :  { %897 = vmatprep.subr.bf16.mxu0 %v1338_v0 }
  0xfd   :  { %916 = vmatpush3.bf16.msra.mxu1 %v996_v19 }
  0xfe   :  { %917 = vmatprep.subr.bf16.mxu1 %v1338_v0 }
  0xff   :  { %898 = vmatpush3.bf16.msra.mxu0 %v989_v10 }
 0x100   :  { %923 = vmatprep.subr.bf16.mxu0 %v1338_v0 }
 0x101   :  { %918 = vmatpush3.bf16.msra.mxu1 %v997_v20 }
 0x102   :  { %900 = vmatmul.mubr.bf16.vlgmr.msra.gmra.mrb[0].mxu0 %v209_v12  ;;  %943 = vmatprep.subr.bf16.mxu1 %v1338_v0 }
 0x103   :  { %939 = vmatprep.mubr.msk.bf16.mxu0 %vm1339_vm0, %v1338_v0  ;;  %924 = vmatpush3.bf16.msra.mxu0 %v998_v58 }
 0x104   :  { %925 = vmatprep.subr.bf16.mxu0 %v1338_v0 }
 0x107   :  { %926 = vmatpush3.bf16.msra.mxu0 %v999_v59 }
 0x108   :  { %927 = vmatprep.subr.bf16.mxu0 %v1338_v0 }
 0x10b   :  { %928 = vmatpush3.bf16.msra.mxu0 %v1000_v60 }
 0x10c   :  { %929 = vmatprep.subr.bf16.mxu0 %v1338_v0 }
 0x10f   :  { %930 = vmatpush3.bf16.msra.mxu0 %v1001_v61 }
 0x110   :  { %931 = vmatprep.subr.bf16.mxu0 %v1338_v0 }
 0x113   :  { %932 = vmatpush3.bf16.msra.mxu0 %v1002_v62 }
 0x114   :  { %933 = vmatprep.subr.bf16.mxu0 %v1338_v0 }
 0x117   :  { %934 = vmatpush3.bf16.msra.mxu0 %v1003_v63 }
 0x118   :  { %935 = vmatprep.subr.bf16.mxu0 %v1338_v0 }
 0x11b   :  { %936 = vmatpush3.bf16.msra.mxu0 %v1004_v1 }
 0x11c   :  { %937 = vmatprep.subr.bf16.mxu0 %v1338_v0 }
 0x11f   :  { %938 = vmatpush3.bf16.msra.mxu0 %v1005_v2 }
 0x167   :  { %v1615_v26 = vpop.permute.xlu0 %323 }
 0x1d5   :  { %v314_v22 = vpop.f32.mrb[0].mxu0 }
 0x1d6   :  { %v315_v23 = vadd.f32 %v805_v21, %v314_v22  ;;  %v901_v24 = vpop.f32.mrb[1].mxu0 }
 0x1d7   :  { %v317_v25 = vpop.f32.mrb[2].mxu0 }
 0x1d8   :  { %v320_v27 = vmax.f32 %v315_v23, 0.0  ;;  %v902_v28 = vpop.f32.mrb[3].mxu0 }
 0x1da   :  { %v326_v29 = vmul.f32 %v1615_v26, %v320_v27 }
 0x1dc   :  { %v327_v30 = vrot.slane %v326_v29, 4  ;;  %v333_v31 = vmul.f32 %v326_v29, %v320_v27 }
 0x1de   :  { %v328_v32 = vadd.f32 %v327_v30, %v326_v29  ;;  %v334_v33 = vrot.slane %v333_v31, 4 }
 0x1e0   :  { %v329_v34 = vrot.slane %v328_v32, 2  ;;  %v335_v35 = vadd.f32 %v334_v33, %v333_v31  ;;  %v825_v33 = vld [vmem:[#allocation14] ss:$0 sm:$0xff] }
 0x1e2   :  { %v330_v36 = vadd.f32 %v329_v34, %v328_v32  ;;  %v336_v37 = vrot.slane %v335_v35, 2 }
 0x1e4   :  { %v331_v38 = vrot.slane %v330_v36, 1  ;;  %v337_v39 = vadd.f32 %v336_v37, %v335_v35  ;;  %v826_v35 = vld [vmem:[#allocation15] ss:$0 sm:$0xff] }
 0x1e6   :  { %v332_v40 = vadd.f32 %v331_v38, %v330_v36  ;;  %v338_v41 = vrot.slane %v337_v39, 1 }
 0x1e8   :  { %v339_v42 = vadd.f32 %v338_v41, %v337_v39  ;;  %v340_v43 = vmul.f32 0.125, %v332_v40  ;;  %v1006_v40 = vld [vmem:[%s1690_s15] sm:$0xff]   ;;  %v1007_v41 = vld [vmem:[%s1690_s15 + $0x8] sm:$0xff]  }
 0x1ea   :  { %v341_v44 = vmul.f32 0.125, %v339_v42  ;;  %v342_v45 = vmul.f32 %v340_v43, %v340_v43  ;;  %v345_v49 = vsub.f32 %v320_v27, %v340_v43  ;;  %v1008_v42 = vld [vmem:[%s1690_s15 + $0x10] sm:$0xff]   ;;  %v1009_v43 = vld [vmem:[%s1690_s15 + $0x18] sm:$0xff]  }
 0x1ec   :  { %v343_v46 = vsub.f32 %v341_v44, %v342_v45  ;;  %v1010_v44 = vld [vmem:[%s1690_s15 + $0x20] sm:$0xff]   ;;  %v1011_v45 = vld [vmem:[%s1690_s15 + $0x28] sm:$0xff]  }
 0x1ee   :  { %v344_v47 = vmax.f32 %v343_v46, 0.0  ;;  %v1012_v46 = vld [vmem:[%s1690_s15 + $0x30] sm:$0xff]  }
 0x1f0   :  { %v346_v48 = vadd.f32 1e-05, %v344_v47  ;;  %v1013_v47 = vld [vmem:[%s1690_s15 + $0x38] sm:$0xff]  }
 0x1f2   :  { %1014 = vrsqrt.f32 %v346_v48  ;;  %v827_v48 = vld [vmem:[#allocation18] ss:$0 sm:$0xff] }
 0x1fc   :  { %v1015_v50 = vpop.eup %1014 }
 0x1fd   :  { %v348_v52 = vmul.f32 %v1015_v50, %v345_v49 }
 0x1ff   :  { %v355_v54 = vmul.f32 %v814_v51, %v348_v52 }
 0x201   :  { %v362_v55 = vadd.f32 %v815_v53, %v355_v54 }
 0x203   :  { %v363_v56 = vmax.f32 %v362_v55, 0.0 }
 0x205   :  { %v367_v57 = vpack.c.bf16 %v363_v56, %v363_v56 }
 0x207   :  { %920 = vmatmul.mubr.bf16.vlgmr.msra.gmra.mrb[0].mxu1 %v367_v57 }
 0x208   :  { %959 = vmatprep.mubr.msk.bf16.mxu1 %vm1339_vm0, %v1338_v0  ;;  %944 = vmatpush3.bf16.msra.mxu1 %v1006_v40 }
 0x209   :  { %945 = vmatprep.subr.bf16.mxu1 %v1338_v0 }
 0x20c   :  { %946 = vmatpush3.bf16.msra.mxu1 %v1007_v41 }
 0x20d   :  { %947 = vmatprep.subr.bf16.mxu1 %v1338_v0 }
 0x210   :  { %948 = vmatpush3.bf16.msra.mxu1 %v1008_v42 }
 0x211   :  { %949 = vmatprep.subr.bf16.mxu1 %v1338_v0 }
 0x214   :  { %950 = vmatpush3.bf16.msra.mxu1 %v1009_v43 }
 0x215   :  { %951 = vmatprep.subr.bf16.mxu1 %v1338_v0 }
 0x218   :  { %952 = vmatpush3.bf16.msra.mxu1 %v1010_v44 }
 0x219   :  { %953 = vmatprep.subr.bf16.mxu1 %v1338_v0 }
 0x21c   :  { %954 = vmatpush3.bf16.msra.mxu1 %v1011_v45 }
 0x21d   :  { %955 = vmatprep.subr.bf16.mxu1 %v1338_v0 }
 0x220   :  { %956 = vmatpush3.bf16.msra.mxu1 %v1012_v46 }
 0x221   :  { %957 = vmatprep.subr.bf16.mxu1 %v1338_v0 }
 0x224   :  { %958 = vmatpush3.bf16.msra.mxu1 %v1013_v47 }
 0x2da   :  { %v472_v4 = vpop.f32.mrb[0].mxu1 }
 0x2db   :  { %v473_v5 = vadd.f32 %v816_v3, %v472_v4  ;;  %v921_v6 = vpop.f32.mrb[1].mxu1 }
 0x2dc   :  { %v475_v7 = vpop.f32.mrb[2].mxu1 }
 0x2dd   :  { %v478_v8 = vmax.f32 %v473_v5, 0.0  ;;  %v922_v9 = vpop.f32.mrb[3].mxu1 }
 0x2df   :  { %v479_v10 = vmul.f32 %v478_v8, %v1615_v26 }
 0x2e1   :  { %v480_v11 = vrot.slane %v479_v10, 4  ;;  %v486_v12 = vmul.f32 %v479_v10, %v478_v8 }
 0x2e3   :  { %v481_v13 = vadd.f32 %v480_v11, %v479_v10  ;;  %v487_v14 = vrot.slane %v486_v12, 4 }
 0x2e5   :  { %v482_v15 = vrot.slane %v481_v13, 2  ;;  %v488_v16 = vadd.f32 %v487_v14, %v486_v12  ;;  %v836_v12 = vld [vmem:[#allocation20] ss:$0 sm:$0xff]  ;;  %v837_v14 = vld [vmem:[#allocation21] ss:$0 sm:$0xff] }
 0x2e7   :  { %v483_v17 = vadd.f32 %v482_v15, %v481_v13  ;;  %v489_v18 = vrot.slane %v488_v16, 2 }
 0x2e9   :  { %v484_v19 = vrot.slane %v483_v17, 1  ;;  %v490_v20 = vadd.f32 %v489_v18, %v488_v16 }
 0x2eb   :  { %v485_v21 = vadd.f32 %v484_v19, %v483_v17  ;;  %v491_v22 = vrot.slane %v490_v20, 1  ;;  %v838_v19 = vld [vmem:[%s1691_s16] ss:$0 sm:$0xff] }
 0x2ed   :  { %v492_v23 = vadd.f32 %v491_v22, %v490_v20  ;;  %v493_v24 = vmul.f32 0.125, %v485_v21 }
 0x2ef   :  { %v494_v25 = vmul.f32 0.125, %v492_v23  ;;  %v495_v27 = vmul.f32 %v493_v24, %v493_v24  ;;  %v498_v31 = vsub.f32 %v478_v8, %v493_v24 }
 0x2f1   :  { %v496_v28 = vsub.f32 %v494_v25, %v495_v27 }
 0x2f3   :  { %v497_v29 = vmax.f32 %v496_v28, 0.0 }
 0x2f5   :  { %v499_v30 = vadd.f32 1e-05, %v497_v29 }
 0x2f7   :  { %1016 = vrsqrt.f32 %v499_v30 }
 0x301   :  { %v1017_v32 = vpop.eup %1016 }
 0x302   :  { %v501_v34 = vmul.f32 %v1017_v32, %v498_v31 }
 0x304   :  { %v508_v36 = vmul.f32 %v825_v33, %v501_v34 }
 0x306   :  { %v515_v37 = vadd.f32 %v826_v35, %v508_v36 }
 0x308   :  { %v516_v38 = vmax.f32 %v515_v37, 0.0 }
 0x30a   :  { %v520_v39 = vpack.c.bf16 %v516_v38, %v516_v38 }
 0x30c   :  { %940 = vmatmul.mubr.bf16.vlgmr.msra.gmra.mrb[4].mxu0 %v520_v39 }
 0x3df   :  { %v625_v49 = vpop.f32.mrb[4].mxu0 }
 0x3e0   :  { %v626_v50 = vadd.f32 %v827_v48, %v625_v49  ;;  %v941_v51 = vpop.f32.mrb[5].mxu0 }
 0x3e1   :  { %v628_v52 = vpop.f32.mrb[6].mxu0 }
 0x3e2   :  { %v631_v53 = vmax.f32 %v626_v50, 0.0  ;;  %v942_v54 = vpop.f32.mrb[7].mxu0 }
 0x3e4   :  { %v632_v55 = vmul.f32 %v631_v53, %v1615_v26 }
 0x3e6   :  { %v633_v56 = vrot.slane %v632_v55, 4  ;;  %v639_v57 = vmul.f32 %v632_v55, %v631_v53 }
 0x3e8   :  { %v634_v58 = vadd.f32 %v633_v56, %v632_v55  ;;  %v640_v59 = vrot.slane %v639_v57, 4 }
 0x3ea   :  { %v635_v60 = vrot.slane %v634_v58, 2  ;;  %v641_v61 = vadd.f32 %v640_v59, %v639_v57 }
 0x3ec   :  { %v636_v62 = vadd.f32 %v635_v60, %v634_v58  ;;  %v642_v63 = vrot.slane %v641_v61, 2 }
 0x3ee   :  { %v637_v1 = vrot.slane %v636_v62, 1  ;;  %v643_v0 = vadd.f32 %v642_v63, %v641_v61 }
 0x3f0   :  { %v638_v2 = vadd.f32 %v637_v1, %v636_v62  ;;  %v644_v3 = vrot.slane %v643_v0, 1 }
 0x3f2   :  { %v645_v4 = vadd.f32 %v644_v3, %v643_v0  ;;  %v646_v5 = vmul.f32 0.125, %v638_v2 }
 0x3f4   :  { %v647_v6 = vmul.f32 0.125, %v645_v4  ;;  %v648_v7 = vmul.f32 %v646_v5, %v646_v5  ;;  %v651_v26 = vsub.f32 %v631_v53, %v646_v5 }
 0x3f6   :  { %v649_v8 = vsub.f32 %v647_v6, %v648_v7 }
 0x3f8   :  { %v650_v9 = vmax.f32 %v649_v8, 0.0 }
 0x3fa   :  { %v652_v10 = vadd.f32 1e-05, %v650_v9 }
 0x3fc   :  { %1018 = vrsqrt.f32 %v652_v10 }
 0x406   :  { %v1019_v11 = vpop.eup %1018 }
 0x407   :  { %v654_v13 = vmul.f32 %v1019_v11, %v651_v26 }
 0x409   :  { %v661_v15 = vmul.f32 %v836_v12, %v654_v13 }
 0x40b   :  { %v668_v16 = vadd.f32 %v837_v14, %v661_v15 }
 0x40d   :  { %v669_v17 = vmax.f32 %v668_v16, 0.0 }
 0x40f   :  { %v671_v18 = vpack.c.bf16 %v669_v17, %v669_v17 }
 0x411   :  { %960 = vmatmul.mubr.bf16.vlgmr.msra.gmra.mrb[4].mxu1 %v671_v18 }
 0x4e4   :  { %v776_v20 = vpop.f32.mrb[4].mxu1 }
 0x4e5   :  { %v777_v21 = vadd.f32 %v838_v19, %v776_v20  ;;  %v961_v22 = vpop.f32.mrb[5].mxu1 }
 0x4e6   :  { %v779_v23 = vpop.f32.mrb[6].mxu1 }
 0x4e7   :  { %1020 = vtanh.f32 %v777_v21  ;;  %v962_v24 = vpop.f32.mrb[7].mxu1 }
 0x4f1   :  { %v1021_v25 = vpop.eup %1020 }
 0x4f2   :  { %783 = vst [vmem:[#allocation23] sm:$0xff] %v1021_v25 }
 0x4f3   :  { %1297 = shalt.err (!%p1294_p2)
}
 0x4f4   :  { %s1697_s13 = sld [smem:[#allocation33_spill]] }
 0x4fa   :  { %s1298_s26 = scalar_lea.hbm %s1697_s13, 128 }
 0x4fb   :  { %p1299_p3 = scmp.ne.s32.totalorder %s1697_s13, %s1298_s26  ;;  %p1302_p4 = scmp.lt.u32.totalorder %s1298_s26, %s1697_s13 }
 0x4fd   :  { %p1304_p5 = pnand %p1302_p4, %p1299_p3 }
 0x4ff   :  { %1307 = shalt.err (!%p1304_p5)
}
 0x500   :  { %793 = dma.vmem_to_hbm [thread:$0]  %s791_s5, 128, %s1697_s13, [#allocation5]  }
 0x501   :  { %1322 = dma.done.wait [#allocation5], 128  }
 0x502   :  { %1323 = vsyncadd [#allocation5], 4294967168 }
 0x503   :  { %797 = vsyncpa [#allocation4], 1 }
 0x504   :  { %798 = vsyncpa [#allocation7], 1 }
 0x505   :  { %799 = vsyncpa [#allocation10], 1 }
 0x506   :  { %800 = vsyncpa [#allocation13], 1 }
 0x507   :  { %801 = vsyncpa [#allocation16], 1 }
 0x508   :  { %802 = vsyncpa [#allocation19], 1 }
 0x509   :  { %803 = vsyncpa [#allocation22], 1 }
 0x50a   :  { %804 = vsyncpa [#allocation5], 1 }

</bundles_post_ra>
